<compile_context>
chip_gen: v6e
topology: v6e:2x2x1
jax: 0.10.0
libtpu: 0.0.40
codegen_flags: <defaults>
</compile_context>

<pallas_src>
import jax
import jax.numpy as jnp
from jax.experimental import pallas as pl
from jax.experimental.pallas import tpu as pltpu


# ---------------------------------------------------------------------------
# Fused multi-layer LSTM kernel factory
# ---------------------------------------------------------------------------
def _make_fused_lstm_kernel(layer_meta):
    """Build the fused kernel for a static per-layer structure.

    layer_meta: list of dicts with static per-layer info:
      n_ext        number of external (caller-provided) input segments
      use_bottomup whether the previous layer's freshly computed h is prepended
      hid          hidden size H
    Flat ref layout passed by pallas_call:
      [ext segs (layer 0..N-1), h0, c0, h1, c1, ..., W0, b0, W1, b1, ...,
       out0, out1, ...]
    """
    n_layers = len(layer_meta)

    def kernel(*refs):
        idx = 0
        ext_refs = []
        for m in layer_meta:
            ext_refs.append(refs[idx:idx + m["n_ext"]])
            idx += m["n_ext"]
        state_refs = []
        for _ in layer_meta:
            state_refs.append((refs[idx], refs[idx + 1]))
            idx += 2
        wb_refs = []
        for _ in layer_meta:
            wb_refs.append((refs[idx], refs[idx + 1]))
            idx += 2
        out_refs = refs[idx:idx + n_layers]

        prev_h = None  # lives in VMEM/vregs across layers, never written to HBM
        for l, m in enumerate(layer_meta):
            H = m["hid"]
            h_ref, c_ref = state_refs[l]
            w_ref, b_ref = wb_refs[l]

            # Assemble the stacked matmul input [bottom-up | externals | h].
            segs = []
            if l > 0 and m["use_bottomup"]:
                segs.append(prev_h)
            for r in ext_refs[l]:
                segs.append(r[...])
            segs.append(h_ref[...])
            full_in = segs[0] if len(segs) == 1 else jnp.concatenate(segs, axis=1)

            # Single MXU matmul per layer against pre-stacked [W_ih; W_hh],
            # bias accumulated into the same f32 result.
            z = jnp.dot(full_in, w_ref[...],
                        preferred_element_type=jnp.float32) + b_ref[...]

            # Full-width masked activation.  Gate order is [i, f, g, o]; only
            # the g block (lanes [2H, 3H)) uses tanh, all others sigmoid.
            col = jax.lax.broadcasted_iota(jnp.int32, z.shape, 1)
            is_g = jnp.logical_and(col >= 2 * H, col < 3 * H)
            act = jnp.where(is_g, jnp.tanh(z), jax.nn.sigmoid(z))

            i_g = act[:, 0 * H:1 * H]
            f_g = act[:, 1 * H:2 * H]
            g_g = act[:, 2 * H:3 * H]
            o_g = act[:, 3 * H:4 * H]
            c_new = f_g * c_ref[...] + i_g * g_g
            h_new = o_g * jnp.tanh(c_new)

            # One packed, lane-dense output per layer: [gates | h | c].
            out = out_refs[l]
            out[:, 0:4 * H] = act.astype(out.dtype)
            out[:, 4 * H:5 * H] = h_new.astype(out.dtype)
            out[:, 5 * H:6 * H] = c_new.astype(out.dtype)

            prev_h = h_new

    return kernel


# ---------------------------------------------------------------------------
# Motor_vision forward-pass port (single fused Pallas call)
# ---------------------------------------------------------------------------
class MotorVisionPallas:
    def __init__(self, num_joints, joint_enc_dim, in_sizes, readout_hid_size,
                 layers, dropout_rate=0.5, is_softmax=True, is_bottomup=True,
                 is_input=True, is_lateral=True, key=None):
        self.is_bottomup = is_bottomup
        self.is_input = is_input
        self.is_lateral = is_lateral
        self.num_joints = num_joints
        self.joint_enc_dim = joint_enc_dim
        self.enc_dim = num_joints * joint_enc_dim
        self.num_layers = len(in_sizes)
        self.hid_sizes = [cfg["hid_size"] for cfg in layers]
        # TODO(synk): dropout_rate / is_softmax / readout_hid_size belong to the
        # (unshown) reference LSTMCell; a standard inference-mode cell returning
        # (h, c, gates) is implemented, with b_ih + b_hh folded into one bias.

        if key is None:
            key = jax.random.PRNGKey(0)

        # Pre-stacked weights: one (in_size + H, 4H) matrix per layer so the
        # kernel does a single MXU dot per layer.  Row order matches the
        # reference input concat ([bottom-up, *incoming, top-down]) followed
        # by the layer's own hidden state.
        self.params = []
        for in_size, hid in zip(in_sizes, self.hid_sizes):
            key, k1, k2 = jax.random.split(key, 3)
            scale = 1.0 / float(hid) ** 0.5
            w = jax.random.uniform(k1, (in_size + hid, 4 * hid),
                                   jnp.float32, -scale, scale)
            b = jax.random.uniform(k2, (1, 4 * hid), jnp.float32, -scale, scale)
            self.params.append((w, b))

    # External (caller-provided) input segments of a layer, in reference order.
    def _layer_ext_segments(self, layer_idx, x, incomings, sxs):
        segs = []
        if layer_idx == 0:
            if self.is_input and x is not None:
                segs.append(x)
            segs.extend(incomings[0])
        else:
            segs.extend(incomings[layer_idx])
        if layer_idx + 1 < self.num_layers:          # top-down hidden state
            segs.append(sxs[layer_idx + 1][0])
        return segs

    def __call__(self, x, incomings, sxs):
        assert len(sxs) == len(incomings), ''
        B = sxs[0][0].shape[0]

        layer_meta = []
        ext_flat = []
        for l in range(self.num_layers):
            segs = self._layer_ext_segments(l, x, incomings, sxs)
            use_bottomup = (l > 0) and self.is_bottomup
            in_width = sum(s.shape[1] for s in segs)
            if use_bottomup:
                in_width += self.hid_sizes[l - 1]
            w, _ = self.params[l]
            assert in_width + self.hid_sizes[l] == w.shape[0], (
                f"layer {l}: input width {in_width} inconsistent with weights")
            layer_meta.append({"n_ext": len(segs),
                               "use_bottomup": use_bottomup,
                               "hid": self.hid_sizes[l]})
            ext_flat.extend(segs)

        state_flat = []
        for sx in sxs:
            state_flat.extend([sx[0], sx[1]])
        wb_flat = []
        for w, b in self.params:
            wb_flat.extend([w, b])
        flat_inputs = ext_flat + state_flat + wb_flat

        vmem = pl.BlockSpec(memory_space=pltpu.MemorySpace.VMEM)
        out_shapes = tuple(jax.ShapeDtypeStruct((B, 6 * h), jnp.float32)
                           for h in self.hid_sizes)

        # Single fused pallas_call for all layers.  Shapes are tiny (~50 KB of
        # weights), so whole-array VMEM blocks and no grid are used; for
        # B >> 8, add a batch grid axis with dimension_semantics=("parallel",)
        # so v7x's second TensorCore is used.
        packed = pl.pallas_call(
            _make_fused_lstm_kernel(layer_meta),
            out_shape=out_shapes,
            in_specs=[vmem] * len(flat_inputs),
            out_specs=tuple(vmem for _ in out_shapes),
        )(*flat_inputs)

        ss, gates = [], []
        for h_size, p in zip(self.hid_sizes, packed):
            gates.append(p[:, :4 * h_size])
            ss.append([p[:, 4 * h_size:5 * h_size], p[:, 5 * h_size:6 * h_size]])
        return ss, gates


# ---------------------------------------------------------------------------
# Pure-JAX reference (for a loose numerical sanity check)
# ---------------------------------------------------------------------------
def _reference_forward(model, x, incomings, sxs):
    hp = jax.lax.Precision.HIGHEST
    ss, gates = [], []
    for l in range(model.num_layers):
        segs = model._layer_ext_segments(l, x, incomings, sxs)
        if l > 0 and model.is_bottomup:
            segs = [ss[-1][0]] + segs
        inp = jnp.concatenate(segs + [sxs[l][0]], axis=1)
        w, b = model.params[l]
        H = model.hid_sizes[l]
        z = jnp.dot(inp, w, precision=hp) + b
        i = jax.nn.sigmoid(z[:, 0 * H:1 * H])
        f = jax.nn.sigmoid(z[:, 1 * H:2 * H])
        g = jnp.tanh(z[:, 2 * H:3 * H])
        o = jax.nn.sigmoid(z[:, 3 * H:4 * H])
        c = f * sxs[l][1] + i * g
        h = o * jnp.tanh(c)
        ss.append([h, c])
        gates.append(jnp.concatenate([i, f, g, o], axis=1))
    return ss, gates


if __name__ == "__main__":
    key = jax.random.PRNGKey(0)

    # Small config: 2 layers.
    B = 2
    num_joints, joint_enc_dim = 2, 4          # enc_dim = 8
    enc_dim = num_joints * joint_enc_dim
    inc_dims = [16, 16]                       # one incoming tensor per layer
    hid_sizes = [32, 32]
    # Layer 0 input = x(8) + incoming0(16) + topdown h1(32) = 56
    # Layer 1 input = h0(32) + incoming1(16)                = 48
    in_sizes = [enc_dim + inc_dims[0] + hid_sizes[1], hid_sizes[0] + inc_dims[1]]
    layers_cfg = [{"hid_size": hid_sizes[0]}, {"hid_size": hid_sizes[1]}]

    key, kp, kx, ki0, ki1, kh0, kc0, kh1, kc1 = jax.random.split(key, 9)

    model = MotorVisionPallas(num_joints, joint_enc_dim, in_sizes,
                              readout_hid_size=16, layers=layers_cfg, key=kp)

    x = jax.random.normal(kx, (B, enc_dim), jnp.float32)
    incomings = [
        [jax.random.normal(ki0, (B, inc_dims[0]), jnp.float32)],
        [jax.random.normal(ki1, (B, inc_dims[1]), jnp.float32)],
    ]
    sxs = [
        [jax.random.normal(kh0, (B, hid_sizes[0]), jnp.float32),
         jax.random.normal(kc0, (B, hid_sizes[0]), jnp.float32)],
        [jax.random.normal(kh1, (B, hid_sizes[1]), jnp.float32),
         jax.random.normal(kc1, (B, hid_sizes[1]), jnp.float32)],
    ]

    ss, gates = model(x, incomings, sxs)
    for (h, c), g in zip(ss, gates):
        jax.block_until_ready(h)
        jax.block_until_ready(c)
        jax.block_until_ready(g)

    # Loose sanity check against a pure-JAX reference (tolerant of MXU f32).
    ss_ref, gates_ref = _reference_forward(model, x, incomings, sxs)
    for (h, c), (hr, cr), g, gr in zip(ss, ss_ref, gates, gates_ref):
        assert float(jnp.max(jnp.abs(h - hr))) < 2e-2
        assert float(jnp.max(jnp.abs(c - cr))) < 2e-2
        assert float(jnp.max(jnp.abs(g - gr))) < 2e-2

    print("KERNEL_OK")
</pallas_src>

<mosaic_0001>
module attributes {stable_mosaic.version = 11 : i64} {
  func.func @kernel(%arg0: memref<2x8xf32, #tpu.memory_space<vmem>>, %arg1: memref<2x16xf32, #tpu.memory_space<vmem>>, %arg2: memref<2x32xf32, #tpu.memory_space<vmem>>, %arg3: memref<2x16xf32, #tpu.memory_space<vmem>>, %arg4: memref<2x32xf32, #tpu.memory_space<vmem>>, %arg5: memref<2x32xf32, #tpu.memory_space<vmem>>, %arg6: memref<2x32xf32, #tpu.memory_space<vmem>>, %arg7: memref<2x32xf32, #tpu.memory_space<vmem>>, %arg8: memref<88x128xf32, #tpu.memory_space<vmem>>, %arg9: memref<1x128xf32, #tpu.memory_space<vmem>>, %arg10: memref<80x128xf32, #tpu.memory_space<vmem>>, %arg11: memref<1x128xf32, #tpu.memory_space<vmem>>, %arg12: memref<2x192xf32, #tpu.memory_space<vmem>>, %arg13: memref<2x192xf32, #tpu.memory_space<vmem>>) attributes {dimension_semantics = [], scalar_prefetch = 0 : i64, scratch_operands = 0 : i64, tpu.core_type = #tpu.core_type<tc>} {
    %c0 = arith.constant 0 : index
    %c0_0 = arith.constant 0 : index
    %0 = vector.load %arg0[%c0, %c0_0] : memref<2x8xf32, #tpu.memory_space<vmem>>, vector<2x8xf32>
    %c0_1 = arith.constant 0 : index
    %c0_2 = arith.constant 0 : index
    %1 = vector.load %arg1[%c0_1, %c0_2] : memref<2x16xf32, #tpu.memory_space<vmem>>, vector<2x16xf32>
    %c0_3 = arith.constant 0 : index
    %c0_4 = arith.constant 0 : index
    %2 = vector.load %arg2[%c0_3, %c0_4] : memref<2x32xf32, #tpu.memory_space<vmem>>, vector<2x32xf32>
    %c0_5 = arith.constant 0 : index
    %c0_6 = arith.constant 0 : index
    %3 = vector.load %arg4[%c0_5, %c0_6] : memref<2x32xf32, #tpu.memory_space<vmem>>, vector<2x32xf32>
    %4 = tpu.concatenate %0, %1, %2, %3 in 1 : vector<2x8xf32>, vector<2x16xf32>, vector<2x32xf32>, vector<2x32xf32> -> vector<2x88xf32>
    %c0_7 = arith.constant 0 : index
    %c0_8 = arith.constant 0 : index
    %5 = vector.load %arg8[%c0_7, %c0_8] : memref<88x128xf32, #tpu.memory_space<vmem>>, vector<88x128xf32>
    %cst = arith.constant dense<0.000000e+00> : vector<2x128xf32>
    %6 = tpu.matmul %4, %5, %cst {dimension_numbers = #tpu.dot_dimension_numbers<[1], [0], [0], [1], [0, 0, 1, 1], [], []>} : vector<2x88xf32>, vector<88x128xf32>, vector<2x128xf32> -> vector<2x128xf32>
    %c0_9 = arith.constant 0 : index
    %c0_10 = arith.constant 0 : index
    %7 = vector.load %arg9[%c0_9, %c0_10] : memref<1x128xf32, #tpu.memory_space<vmem>>, vector<1x128xf32>
    %8 = vector.broadcast %7 : vector<1x128xf32> to vector<2x128xf32>
    %9 = arith.addf %6, %8 : vector<2x128xf32>
    %10 = tpu.iota {dimensions = array<i32: 1>} : vector<2x128xi32>
    %c64_i32 = arith.constant 64 : i32
    %11 = vector.broadcast %c64_i32 : i32 to vector<2x128xi32>
    %12 = arith.cmpi sge, %10, %11 : vector<2x128xi32>
    %c96_i32 = arith.constant 96 : i32
    %13 = vector.broadcast %c96_i32 : i32 to vector<2x128xi32>
    %14 = arith.cmpi slt, %10, %13 : vector<2x128xi32>
    %15 = arith.andi %12, %14 : vector<2x128xi1>
    %16 = math.tanh %9 : vector<2x128xf32>
    %17 = arith.negf %9 : vector<2x128xf32>
    %18 = math.exp %17 : vector<2x128xf32>
    %cst_11 = arith.constant 1.000000e+00 : f32
    %19 = vector.broadcast %cst_11 : f32 to vector<2x128xf32>
    %20 = arith.addf %19, %18 : vector<2x128xf32>
    %21 = arith.divf %19, %20 : vector<2x128xf32>
    %22 = arith.select %15, %16, %21 : vector<2x128xi1>, vector<2x128xf32>
    %23 = vector.extract_strided_slice %22 {offsets = [0, 0], sizes = [2, 32], strides = [1, 1]} : vector<2x128xf32> to vector<2x32xf32>
    %24 = vector.extract_strided_slice %22 {offsets = [0, 32], sizes = [2, 32], strides = [1, 1]} : vector<2x128xf32> to vector<2x32xf32>
    %25 = vector.extract_strided_slice %22 {offsets = [0, 64], sizes = [2, 32], strides = [1, 1]} : vector<2x128xf32> to vector<2x32xf32>
    %26 = vector.extract_strided_slice %22 {offsets = [0, 96], sizes = [2, 32], strides = [1, 1]} : vector<2x128xf32> to vector<2x32xf32>
    %c0_12 = arith.constant 0 : index
    %c0_13 = arith.constant 0 : index
    %27 = vector.load %arg5[%c0_12, %c0_13] : memref<2x32xf32, #tpu.memory_space<vmem>>, vector<2x32xf32>
    %28 = arith.mulf %24, %27 : vector<2x32xf32>
    %29 = arith.mulf %23, %25 : vector<2x32xf32>
    %30 = arith.addf %28, %29 : vector<2x32xf32>
    %31 = math.tanh %30 : vector<2x32xf32>
    %32 = arith.mulf %26, %31 : vector<2x32xf32>
    %c0_14 = arith.constant 0 : index
    %c0_15 = arith.constant 0 : index
    %33 = vector.load %arg12[%c0_14, %c0_15] : memref<2x192xf32, #tpu.memory_space<vmem>>, vector<2x128xf32>
    tpu.vector_store %arg12[%c0_14, %c0_15], %22 {strides = array<i32>} : memref<2x192xf32, #tpu.memory_space<vmem>>, vector<2x128xf32>,
    %c0_16 = arith.constant 0 : index
    %c128 = arith.constant 128 : index
    %34 = vector.load %arg12[%c0_16, %c128] : memref<2x192xf32, #tpu.memory_space<vmem>>, vector<2x32xf32>
    tpu.vector_store %arg12[%c0_16, %c128], %32 {strides = array<i32>} : memref<2x192xf32, #tpu.memory_space<vmem>>, vector<2x32xf32>,
    %c0_17 = arith.constant 0 : index
    %c160 = arith.constant 160 : index
    %35 = vector.load %arg12[%c0_17, %c160] : memref<2x192xf32, #tpu.memory_space<vmem>>, vector<2x32xf32>
    tpu.vector_store %arg12[%c0_17, %c160], %30 {strides = array<i32>} : memref<2x192xf32, #tpu.memory_space<vmem>>, vector<2x32xf32>,
    %c0_18 = arith.constant 0 : index
    %c0_19 = arith.constant 0 : index
    %36 = vector.load %arg3[%c0_18, %c0_19] : memref<2x16xf32, #tpu.memory_space<vmem>>, vector<2x16xf32>
    %c0_20 = arith.constant 0 : index
    %c0_21 = arith.constant 0 : index
    %37 = vector.load %arg6[%c0_20, %c0_21] : memref<2x32xf32, #tpu.memory_space<vmem>>, vector<2x32xf32>
    %38 = tpu.concatenate %32, %36, %37 in 1 : vector<2x32xf32>, vector<2x16xf32>, vector<2x32xf32> -> vector<2x80xf32>
    %c0_22 = arith.constant 0 : index
    %c0_23 = arith.constant 0 : index
    %39 = vector.load %arg10[%c0_22, %c0_23] : memref<80x128xf32, #tpu.memory_space<vmem>>, vector<80x128xf32>
    %cst_24 = arith.constant dense<0.000000e+00> : vector<2x128xf32>
    %40 = tpu.matmul %38, %39, %cst_24 {dimension_numbers = #tpu.dot_dimension_numbers<[1], [0], [0], [1], [0, 0, 1, 1], [], []>} : vector<2x80xf32>, vector<80x128xf32>, vector<2x128xf32> -> vector<2x128xf32>
    %c0_25 = arith.constant 0 : index
    %c0_26 = arith.constant 0 : index
    %41 = vector.load %arg11[%c0_25, %c0_26] : memref<1x128xf32, #tpu.memory_space<vmem>>, vector<1x128xf32>
    %42 = vector.broadcast %41 : vector<1x128xf32> to vector<2x128xf32>
    %43 = arith.addf %40, %42 : vector<2x128xf32>
    %44 = tpu.iota {dimensions = array<i32: 1>} : vector<2x128xi32>
    %c64_i32_27 = arith.constant 64 : i32
    %45 = vector.broadcast %c64_i32_27 : i32 to vector<2x128xi32>
    %46 = arith.cmpi sge, %44, %45 : vector<2x128xi32>
    %c96_i32_28 = arith.constant 96 : i32
    %47 = vector.broadcast %c96_i32_28 : i32 to vector<2x128xi32>
    %48 = arith.cmpi slt, %44, %47 : vector<2x128xi32>
    %49 = arith.andi %46, %48 : vector<2x128xi1>
    %50 = math.tanh %43 : vector<2x128xf32>
    %51 = arith.negf %43 : vector<2x128xf32>
    %52 = math.exp %51 : vector<2x128xf32>
    %cst_29 = arith.constant 1.000000e+00 : f32
    %53 = vector.broadcast %cst_29 : f32 to vector<2x128xf32>
    %54 = arith.addf %53, %52 : vector<2x128xf32>
    %55 = arith.divf %53, %54 : vector<2x128xf32>
    %56 = arith.select %49, %50, %55 : vector<2x128xi1>, vector<2x128xf32>
    %57 = vector.extract_strided_slice %56 {offsets = [0, 0], sizes = [2, 32], strides = [1, 1]} : vector<2x128xf32> to vector<2x32xf32>
    %58 = vector.extract_strided_slice %56 {offsets = [0, 32], sizes = [2, 32], strides = [1, 1]} : vector<2x128xf32> to vector<2x32xf32>
    %59 = vector.extract_strided_slice %56 {offsets = [0, 64], sizes = [2, 32], strides = [1, 1]} : vector<2x128xf32> to vector<2x32xf32>
    %60 = vector.extract_strided_slice %56 {offsets = [0, 96], sizes = [2, 32], strides = [1, 1]} : vector<2x128xf32> to vector<2x32xf32>
    %c0_30 = arith.constant 0 : index
    %c0_31 = arith.constant 0 : index
    %61 = vector.load %arg7[%c0_30, %c0_31] : memref<2x32xf32, #tpu.memory_space<vmem>>, vector<2x32xf32>
    %62 = arith.mulf %58, %61 : vector<2x32xf32>
    %63 = arith.mulf %57, %59 : vector<2x32xf32>
    %64 = arith.addf %62, %63 : vector<2x32xf32>
    %65 = math.tanh %64 : vector<2x32xf32>
    %66 = arith.mulf %60, %65 : vector<2x32xf32>
    %c0_32 = arith.constant 0 : index
    %c0_33 = arith.constant 0 : index
    %67 = vector.load %arg13[%c0_32, %c0_33] : memref<2x192xf32, #tpu.memory_space<vmem>>, vector<2x128xf32>
    tpu.vector_store %arg13[%c0_32, %c0_33], %56 {strides = array<i32>} : memref<2x192xf32, #tpu.memory_space<vmem>>, vector<2x128xf32>,
    %c0_34 = arith.constant 0 : index
    %c128_35 = arith.constant 128 : index
    %68 = vector.load %arg13[%c0_34, %c128_35] : memref<2x192xf32, #tpu.memory_space<vmem>>, vector<2x32xf32>
    tpu.vector_store %arg13[%c0_34, %c128_35], %66 {strides = array<i32>} : memref<2x192xf32, #tpu.memory_space<vmem>>, vector<2x32xf32>,
    %c0_36 = arith.constant 0 : index
    %c160_37 = arith.constant 160 : index
    %69 = vector.load %arg13[%c0_36, %c160_37] : memref<2x192xf32, #tpu.memory_space<vmem>>, vector<2x32xf32>
    tpu.vector_store %arg13[%c0_36, %c160_37], %64 {strides = array<i32>} : memref<2x192xf32, #tpu.memory_space<vmem>>, vector<2x32xf32>,
    return
  }
}

</mosaic_0001>

<bundles_post_ra>
// kernel: tpu_custom_call.1
= control target key start
LH: loop header
LB: loop body
LE: loop exit
PB: predicated region body
PF: predicated region fallthrough
CT: control target
= control target key end

     0   :  { %19 = vsyncpa [#allocation3], 0  ;;  %s864_s0 = inlined_call_operand.hbm [shape: f32[2,8], index: 0, kind: input, shape index: {}]   ;;  %s865_s1 = inlined_call_operand.hbm [shape: f32[2,16], index: 1, kind: input, shape index: {}]   ;;  %s866_s2 = inlined_call_operand.vmem [shape: f32[2,32], index: 2, kind: input, shape index: {}]   ;;  %s867_s3 = inlined_call_operand.vmem [shape: f32[2,16], index: 3, kind: input, shape index: {}]   ;;  %s868_s4 = inlined_call_operand.vmem [shape: f32[2,32], index: 4, kind: input, shape index: {}]   ;;  %s869_s5 = inlined_call_operand.vmem [shape: f32[2,32], index: 5, kind: input, shape index: {}]   ;;  %s870_s6 = inlined_call_operand.vmem [shape: f32[2,32], index: 6, kind: input, shape index: {}]   ;;  %s871_s7 = inlined_call_operand.vmem [shape: f32[2,32], index: 7, kind: input, shape index: {}]   ;;  %s872_s8 = inlined_call_operand.hbm [shape: f32[88,128], index: 8, kind: input, shape index: {}]   ;;  %s873_s9 = inlined_call_operand.vmem [shape: f32[1,128], index: 9, kind: input, shape index: {}]   ;;  %s874_s10 = inlined_call_operand.hbm [shape: f32[80,128], index: 10, kind: input, shape index: {}]   ;;  %s875_s11 = inlined_call_operand.vmem [shape: f32[1,128], index: 11, kind: input, shape index: {}]   ;;  %s876_s12 = inlined_call_operand.hbm [shape: f32[2,192], index: 12, kind: output, shape index: {0}]   ;;  %s877_s13 = inlined_call_operand.hbm [shape: f32[2,192], index: 13, kind: output, shape index: {1}]  }
   0x1   :  { %20 = vsyncpa [#allocation6], 0 }
   0x2   :  { %21 = vsyncpa [#allocation9], 0 }
   0x3   :  { %22 = vsyncpa [#allocation4], 0 }
   0x4   :  { %23 = vsyncpa [#allocation12], 0  ;;  %s683_s25 = smov [#allocation5]   ;;  %s684_s27 = smov [#allocation2]  }
   0x5   :  { %s40_s26 = sshll.u32 %s683_s25, 4  ;;  %s30_s28 = sshll.u32 %s684_s27, 4  ;;  %s41_s26 = int_to_ptr.vmem [resolvable:$true] %s40_s26  ;;  %s31_s28 = int_to_ptr.vmem [resolvable:$true] %s30_s28 }
   0x6   :  { %s561_s29 = scalar_lea.vmem %s41_s26, 32  ;;  %p566_p1 = scmp.lt.s32.totalorder %s41_s26, %s41_s26 }
   0x7   :  { %p562_p0 = scmp.ne.s32.totalorder %s41_s26, %s561_s29  ;;  %p567_p2 = scmp.lt.s32.totalorder %s561_s29, %s561_s29 }
   0x9   :  { %p568_p3 = por %p567_p2, %p566_p1 }
   0xb   :  { %p569_p4 = pnand %p568_p3, %p562_p0 }
   0xd   :  { %572 = shalt.err (!%p569_p4)
}
   0xe   :  { %43 = dma.hbm_to_vmem [thread:$0]  %s865_s1, 32, %s41_s26, [#allocation6]  }
   0xf   :  { %s581_s15 = scalar_lea.vmem %s31_s28, 32  ;;  %p586_p6 = scmp.lt.s32.totalorder %s31_s28, %s31_s28 }
  0x10   :  { %p582_p5 = scmp.ne.s32.totalorder %s31_s28, %s581_s15  ;;  %p587_p7 = scmp.lt.s32.totalorder %s581_s15, %s581_s15 }
  0x12   :  { %p588_p8 = por %p587_p7, %p586_p6 }
  0x14   :  { %p589_p9 = pnand %p588_p8, %p582_p5 }
  0x16   :  { %592 = shalt.err (!%p589_p9)
}
  0x17   :  { %33 = dma.hbm_to_vmem [thread:$0]  %s864_s0, 32, %s31_s28, [#allocation3]  }
  0x18   :  { %s685_s18 = smov [#allocation7]  }
  0x19   :  { %s61_s19 = sshll.u32 %s685_s18, 4  ;;  %s62_s19 = int_to_ptr.vmem [resolvable:$true] %s61_s19 }
  0x1a   :  { %s601_s20 = scalar_lea.vmem %s62_s19, 1408  ;;  %p606_p11 = scmp.lt.s32.totalorder %s62_s19, %s62_s19 }
  0x1b   :  { %p602_p10 = scmp.ne.s32.totalorder %s62_s19, %s601_s20  ;;  %p607_p12 = scmp.lt.s32.totalorder %s601_s20, %s601_s20 }
  0x1d   :  { %p608_p13 = por %p607_p12, %p606_p11 }
  0x1f   :  { %p609_p0 = pnand %p608_p13, %p602_p10 }
  0x21   :  { %612 = shalt.err (!%p609_p0)
}
  0x22   :  { %s686_s1 = smov 128   ;;  %s687_s21 = smov 8  }
  0x23   :  { %67 = dma.hbm_to_vmem [thread:$0]  %s872_s8, 1408, %s62_s19, [#allocation6], %s686_s1, %s686_s1, %s687_s21  }
  0x24   :  { %s688_s24 = smov [#allocation8]  }
  0x25   :  { %s75_s25 = sshll.u32 %s688_s24, 4  ;;  %s76_s25 = int_to_ptr.vmem [resolvable:$true] %s75_s25 }
  0x26   :  { %s621_s0 = scalar_lea.vmem %s76_s25, 1280  ;;  %p626_p2 = scmp.lt.s32.totalorder %s76_s25, %s76_s25 }
  0x27   :  { %p622_p1 = scmp.ne.s32.totalorder %s76_s25, %s621_s0  ;;  %p627_p3 = scmp.lt.s32.totalorder %s621_s0, %s621_s0 }
  0x29   :  { %p628_p4 = por %p627_p3, %p626_p2 }
  0x2b   :  { %p629_p5 = pnand %p628_p4, %p622_p1 }
  0x2d   :  { %632 = shalt.err (!%p629_p5)
}
  0x2e   :  { %81 = dma.hbm_to_vmem [thread:$0]  %s874_s10, 1280, %s76_s25, [#allocation9], %s686_s1, %s686_s1, %s687_s21  }
  0x2f   :  { %673 = dma.done.wait [#allocation3], 32  }
  0x30   :  { %674 = vsyncadd [#allocation3], 4294967264 }
  0x31   :  { %675 = dma.done.wait [#allocation6], 1440  }
  0x32   :  { %676 = vsyncadd [#allocation6], 4294965856 }
  0x33   :  { %677 = dma.done.wait [#allocation9], 1280  }
  0x34   :  { %678 = vsyncadd [#allocation9], 4294966016  ;;  %v689_v0 = vmov 0.0   ;;  %vm690_vm0 = vmmov 0   ;;  %v97_v1 = vld [vmem:[#allocation5] sm:$0x3]  ;;  %v210_v30 = vlaneseq }
  0x35   :  { %473 = vmatprep.subr.mxu0 %v689_v0  ;;  %498 = vmatprep.subr.mxu1 %v689_v0  ;;  %v99_v2 = vld [vmem:[%s868_s4] sm:$0x3]  ;;  %s691_s10 = smov 56   ;;  %v128_v3 = vld [vmem:[#allocation7 + $0x50] sm:$0xff]  ;;  %v127_v4 = vld [vmem:[#allocation7 + $0x48] sm:$0xff]  ;;  %s692_s14 = smov 24  }
  0x36   :  { %495 = vmatprep.mubr.msk.f32.mxu0 %vm690_vm0, %v689_v0  ;;  %518 = vmatprep.mubr.msk.f32.mxu1 %vm690_vm0, %v689_v0  ;;  %v98_v5 = vld [vmem:[%s866_s2] sm:$0x3]  ;;  %v126_v6 = vld [vmem:[#allocation7 + $0x40] sm:$0xff]  ;;  %v124_v9 = vld [vmem:[#allocation7 + $0x30] sm:$0xff]  ;;  %s693_s2 = smov 32   ;;  %vm112_vm1 = vcmask 64512  }
  0x37   :  { %101 = vrot.lane.b32.xlu0 %v97_v1, %s687_s21  ;;  %109 = vrot.lane.b32.xlu1 %v99_v2, %s691_s10  ;;  %v125_v7 = vld [vmem:[#allocation7 + $0x38] sm:$0xff]  ;;  %v123_v10 = vld [vmem:[#allocation7 + $0x28] sm:$0xff]  ;;  %v122_v11 = vld [vmem:[#allocation7 + $0x20] sm:$0xff]  ;;  %vm114_vm2 = vcmask 195584   ;;  %vm116_vm3 = vcmask 457728   ;;  %vm136_vm4 = vcmask 719872  }
  0x38   :  { %474 = vmatpush3.msra.mxu0 %v128_v3  ;;  %v223_v8 = vld [vmem:[%s869_s5] sm:$0x3]  ;;  %v120_v13 = vld [vmem:[#allocation7 + $0x10] sm:$0xff]  ;;  %v119_v14 = vld [vmem:[#allocation7 + $0x8] sm:$0xff]  ;;  %v211_v31 = vand.u32 127, %v210_v30  ;;  %s695_s20 = smov 48  }
  0x39   :  { %475 = vmatprep.subr.mxu0 %v689_v0  ;;  %v121_v12 = vld [vmem:[#allocation7 + $0x18] sm:$0xff]  ;;  %v118_v15 = vld [vmem:[#allocation7] sm:$0xff]  ;;  %v285_v44 = vld [vmem:[#allocation8 + $0x38] sm:$0xff]  ;;  %vm274_vm8 = vcmask 261120   ;;  %vm276_vm9 = vcmask 392192   ;;  %vm295_vm10 = vcmask 654336  }
  0x3a   :  { %476 = vmatpush3.msra.mxu0 %v127_v4  ;;  %v96_v17 = vld [vmem:[#allocation2] sm:$0x3]  ;;  %vm212_vm5 = vcmp.ge.s32.totalorder %v211_v31, 64  ;;  %vm213_vm6 = vcmp.lt.s32.totalorder %v211_v31, 96  ;;  %v287_v42 = vld [vmem:[#allocation8 + $0x48] sm:$0xff]  ;;  %v284_v45 = vld [vmem:[#allocation8 + $0x30] sm:$0xff] }
  0x3b   :  { %105 = vrot.lane.b32.xlu0 %v98_v5, %s692_s14  ;;  %477 = vmatprep.subr.mxu0 %v689_v0  ;;  %v444_v23 = vld [vmem:[%s873_s9] ss:$0 sm:$0xff]  ;;  %vm809_vm7 = vmand %vm212_vm5, %vm213_vm6  ;;  %s694_s9 = smov 64   ;;  %v283_v47 = vld [vmem:[#allocation8 + $0x28] sm:$0xff]  ;;  %vm257_vm11 = vcmask 254976   ;;  %vm259_vm12 = vcmask 517376  }
  0x3c   :  { %478 = vmatpush3.msra.mxu0 %v126_v6  ;;  %v286_v43 = vld [vmem:[#allocation8 + $0x40] sm:$0xff]  ;;  %499 = vmatpush3.msra.mxu1 %v287_v42  ;;  %v281_v50 = vld [vmem:[#allocation8 + $0x18] sm:$0xff]  ;;  %v280_v51 = vld [vmem:[#allocation8 + $0x10] sm:$0xff] }
  0x3d   :  { %479 = vmatprep.subr.mxu0 %v689_v0  ;;  %500 = vmatprep.subr.mxu1 %v689_v0  ;;  %v261_v48 = vld [vmem:[%s867_s3] sm:$0x3]  ;;  %v279_v52 = vld [vmem:[#allocation8 + $0x8] sm:$0xff] }
  0x3e   :  { %480 = vmatpush3.msra.mxu0 %v125_v7  ;;  %501 = vmatpush3.msra.mxu1 %v286_v43  ;;  %v282_v49 = vld [vmem:[#allocation8 + $0x20] sm:$0xff] }
  0x3f   :  { %481 = vmatprep.subr.mxu0 %v689_v0  ;;  %225 = vrot.lane.b32.xlu0 %v223_v8, %s693_s2  ;;  %v278_v53 = vld [vmem:[#allocation8] sm:$0xff] }
  0x40   :  { %482 = vmatpush3.msra.mxu0 %v124_v9  ;;  %502 = vmatprep.subr.mxu1 %v689_v0  ;;  %v262_v56 = vld [vmem:[%s870_s6] sm:$0x3]  ;;  %v696_v9 = vmov 1983009808   ;;  %s697_s6 = smov [#allocation10]  }
  0x41   :  { %483 = vmatprep.subr.mxu0 %v689_v0  ;;  %503 = vmatpush3.msra.mxu1 %v285_v44  ;;  %v377_v57 = vld [vmem:[%s871_s7] sm:$0x3]  ;;  %s419_s7 = sshll.u32 %s697_s6, 4  ;;  %s420_s7 = int_to_ptr.vmem [resolvable:$true] %s419_s7 }
  0x42   :  { %484 = vmatpush3.msra.mxu0 %v123_v10  ;;  %504 = vmatprep.subr.mxu1 %v689_v0  ;;  %v447_v63 = vld [vmem:[%s875_s11] ss:$0 sm:$0xff]  ;;  %v248_v10 = vunpack.c.l.s4 %v696_v9  ;;  %s633_s11 = scalar_lea.vmem %s420_s7, 64  ;;  %p638_p7 = scmp.lt.s32.totalorder %s420_s7, %s420_s7 }
  0x43   :  { %485 = vmatprep.subr.mxu0 %v689_v0  ;;  %505 = vmatpush3.msra.mxu1 %v284_v45  ;;  %p634_p6 = scmp.ne.s32.totalorder %s420_s7, %s633_s11  ;;  %p639_p8 = scmp.lt.s32.totalorder %s633_s11, %s633_s11 }
  0x44   :  { %486 = vmatpush3.msra.mxu0 %v122_v11  ;;  %506 = vmatprep.subr.mxu1 %v689_v0  ;;  %v249_v11 = vunpack.c.0.s8 %v248_v10 }
  0x45   :  { %487 = vmatprep.subr.mxu0 %v689_v0  ;;  %507 = vmatpush3.msra.mxu1 %v283_v47  ;;  %p640_p9 = por %p639_p8, %p638_p7 }
  0x46   :  { %488 = vmatpush3.msra.mxu0 %v121_v12  ;;  %508 = vmatprep.subr.mxu1 %v689_v0  ;;  %v251_v12 = vshrl.u32 %v210_v30, 7 }
  0x47   :  { %489 = vmatprep.subr.mxu0 %v689_v0  ;;  %509 = vmatpush3.msra.mxu1 %v282_v49  ;;  %p641_p10 = pnand %p640_p9, %p634_p6 }
  0x48   :  { %490 = vmatpush3.msra.mxu0 %v120_v13  ;;  %510 = vmatprep.subr.mxu1 %v689_v0 }
  0x49   :  { %491 = vmatprep.subr.mxu0 %v689_v0  ;;  %511 = vmatpush3.msra.mxu1 %v281_v50 }
  0x4a   :  { %492 = vmatpush3.msra.mxu0 %v119_v14  ;;  %512 = vmatprep.subr.mxu1 %v689_v0  ;;  %v252_v14 = vsub.s32 %v249_v11, %v251_v12 }
  0x4b   :  { %493 = vmatprep.subr.mxu0 %v689_v0  ;;  %513 = vmatpush3.msra.mxu1 %v280_v51 }
  0x4c   :  { %494 = vmatpush3.msra.mxu0 %v118_v15  ;;  %514 = vmatprep.subr.mxu1 %v689_v0 }
  0x4d   :  { %515 = vmatpush3.msra.mxu1 %v279_v52 }
  0x4e   :  { %516 = vmatprep.subr.mxu1 %v689_v0 }
  0x4f   :  { %517 = vmatpush3.msra.mxu1 %v278_v53 }
  0xa9   :  { %v102_v16 = vpop.permute.xlu0 %101  ;;  %v110_v18 = vpop.permute.xlu1 %109 }
  0xaa   :  { %v113_v19 = vsel %vm112_vm1, %v96_v17, %v102_v16 }
  0xad   :  { %v106_v20 = vpop.permute.xlu0 %105 }
  0xae   :  { %v115_v21 = vsel %vm114_vm2, %v113_v19, %v106_v20 }
  0xaf   :  { %v117_v22 = vsel %vm116_vm3, %v115_v21, %v110_v18 }
  0xb0   :  { %496 = vmatmul.mubr.msk.f32.vlgmr.msra.gmra.mxu0 %vm136_vm4, %v117_v22 }
  0xb1   :  { %v226_v38 = vpop.permute.xlu0 %225 }
 0x170   :  { %v206_v24 = vpop.f32.mrf.mxu0 }
 0x171   :  { %v207_v25 = vadd.f32 %v444_v23, %v206_v24 }
 0x172   :  { %v497_v26 = vpop.f32.mrf.mxu0 }
 0x173   :  { %v446_v27 = vmul.f32 -1.442695, %v207_v25 }
 0x175   :  { %537 = vpow2.f32 %v446_v27 }
 0x176   :  { %539 = vtanh.f32 %v207_v25 }
 0x182   :  { %v538_v28 = vpop.eup %537 }
 0x183   :  { %v219_v29 = vadd.f32 1.0, %v538_v28  ;;  %v540_v33 = vpop.eup %539 }
 0x185   :  { %541 = vrcp.f32 %v219_v29 }
 0x192   :  { %v542_v34 = vpop.eup %541 }
 0x193   :  { %v222_v35 = vsel %vm809_vm7, %v540_v33, %v542_v34 }
 0x194   :  { %245 = vst [vmem:[#allocation10] sm:$0x3] %v222_v35  ;;  %230 = vrot.lane.b32.xlu1 %v222_v35, %s694_s9  ;;  %v228_v39 = vmul.f32 %v226_v38, %v222_v35 }
 0x206   :  { %v231_v36 = vpop.permute.xlu1 %230 }
 0x207   :  { %v233_v37 = vmul.f32 %v231_v36, %v222_v35 }
 0x209   :  { %235 = vrot.lane.b32.xlu1 %v233_v37, %s693_s2 }
 0x27b   :  { %v236_v40 = vpop.permute.xlu1 %235 }
 0x27c   :  { %v817_v41 = vadd.f32 %v236_v40, %v228_v39 }
 0x27e   :  { %543 = vtanh.f32 %v817_v41 }
 0x28b   :  { %v544_v46 = vpop.eup %543 }
 0x28c   :  { %241 = vrot.lane.b32.xlu0 %v544_v46, %s694_s9 }
 0x290   :  { %267 = vrot.lane.b32.xlu0 %v261_v48, %s693_s2 }
 0x2fe   :  { %v242_v54 = vpop.permute.xlu0 %241 }
 0x2ff   :  { %v244_v55 = vmul.f32 %v242_v54, %v222_v35 }
 0x301   :  { %263 = vrot.lane.b32.xlu1 %v244_v55, %s693_s2  ;;  %v253_v16 = vrot.slane %v244_v55, %v252_v14 }
 0x302   :  { %v268_v59 = vpop.permute.xlu0 %267 }
 0x305   :  { %271 = vrot.lane.b32.xlu1 %v262_v56, %s695_s20 }
 0x309   :  { %379 = vrot.lane.b32.xlu1 %v377_v57, %s693_s2 }
 0x373   :  { %v264_v58 = vpop.permute.xlu1 %263 }
 0x374   :  { %v275_v60 = vsel %vm274_vm8, %v264_v58, %v268_v59 }
 0x377   :  { %v272_v61 = vpop.permute.xlu1 %271 }
 0x378   :  { %v277_v62 = vsel %vm276_vm9, %v275_v60, %v272_v61 }
 0x379   :  { %519 = vmatmul.mubr.msk.f32.vlgmr.msra.gmra.mxu1 %vm295_vm10, %v277_v62 }
 0x37b   :  { %v380_v17 = vpop.permute.xlu1 %379 }
 0x439   :  { %v365_v0 = vpop.f32.mrf.mxu1 }
 0x43a   :  { %v366_v1 = vadd.f32 %v447_v63, %v365_v0 }
 0x43b   :  { %v520_v2 = vpop.f32.mrf.mxu1 }
 0x43c   :  { %v449_v3 = vmul.f32 -1.442695, %v366_v1 }
 0x43e   :  { %545 = vpow2.f32 %v449_v3 }
 0x43f   :  { %547 = vtanh.f32 %v366_v1 }
 0x44b   :  { %v546_v4 = vpop.eup %545 }
 0x44c   :  { %v373_v5 = vadd.f32 1.0, %v546_v4  ;;  %v548_v6 = vpop.eup %547 }
 0x44e   :  { %549 = vrcp.f32 %v373_v5 }
 0x45b   :  { %v550_v7 = vpop.eup %549 }
 0x45c   :  { %v376_v8 = vsel %vm809_vm7, %v548_v6, %v550_v7 }
 0x45d   :  { %399 = vst [vmem:[#allocation11] sm:$0x3] %v376_v8  ;;  %384 = vrot.lane.b32.xlu0 %v376_v8, %s694_s9  ;;  %v382_v18 = vmul.f32 %v380_v17, %v376_v8 }
 0x4cf   :  { %v385_v13 = vpop.permute.xlu0 %384 }
 0x4d0   :  { %v387_v15 = vmul.f32 %v385_v13, %v376_v8 }
 0x4d2   :  { %389 = vrot.lane.b32.xlu0 %v387_v15, %s693_s2 }
 0x4d6   :  { %254 = vrot.lane.b32.xlu0 %v253_v16, %s693_s2 }
 0x544   :  { %v390_v19 = vpop.permute.xlu0 %389 }
 0x545   :  { %v392_v20 = vadd.f32 %v390_v19, %v382_v18 }
 0x547   :  { %551 = vtanh.f32 %v392_v20 }
 0x548   :  { %v255_v21 = vpop.permute.xlu0 %254 }
 0x549   :  { %258 = vst.msk [vmem:[#allocation10 + $0x2] sm:$0x3] %vm257_vm11, %v255_v21 }
 0x54a   :  { %260 = vst.msk [vmem:[#allocation10 + $0x2] sm:$0x3] %vm259_vm12, %v817_v41 }
 0x554   :  { %v552_v22 = vpop.eup %551 }
 0x555   :  { %395 = vrot.lane.b32.xlu1 %v552_v22, %s694_s9 }
 0x556   :  { %644 = shalt.err (!%p641_p10)
}
 0x557   :  { %422 = dma.vmem_to_hbm [thread:$0]  %s420_s7, 64, %s876_s12, [#allocation4]  }
 0x558   :  { %s698_s0 = smov [#allocation11]  }
 0x559   :  { %s429_s26 = sshll.u32 %s698_s0, 4  ;;  %s430_s26 = int_to_ptr.vmem [resolvable:$true] %s429_s26 }
 0x55a   :  { %s653_s27 = scalar_lea.vmem %s430_s26, 64  ;;  %p658_p12 = scmp.lt.s32.totalorder %s430_s26, %s430_s26 }
 0x55b   :  { %p654_p11 = scmp.ne.s32.totalorder %s430_s26, %s653_s27  ;;  %p659_p13 = scmp.lt.s32.totalorder %s653_s27, %s653_s27 }
 0x55d   :  { %p660_p0 = por %p659_p13, %p658_p12 }
 0x55f   :  { %p661_p1 = pnand %p660_p0, %p654_p11 }
 0x5c7   :  { %v396_v23 = vpop.permute.xlu1 %395 }
 0x5c8   :  { %v398_v24 = vmul.f32 %v396_v23, %v376_v8 }
 0x5ca   :  { %v407_v25 = vrot.slane %v398_v24, %v252_v14 }
 0x5cc   :  { %408 = vrot.lane.b32.xlu1 %v407_v25, %s693_s2 }
 0x63e   :  { %v409_v26 = vpop.permute.xlu1 %408 }
 0x63f   :  { %411 = vst.msk [vmem:[#allocation11 + $0x2] sm:$0x3] %vm257_vm11, %v409_v26 }
 0x640   :  { %412 = vst.msk [vmem:[#allocation11 + $0x2] sm:$0x3] %vm259_vm12, %v392_v20 }
 0x641   :  { %664 = shalt.err (!%p661_p1)
}
 0x642   :  { %432 = dma.vmem_to_hbm [thread:$0]  %s430_s26, 64, %s877_s13, [#allocation12]  }
 0x643   :  { %679 = dma.done.wait [#allocation4], 64  }
 0x644   :  { %680 = vsyncadd [#allocation4], 4294967232 }
 0x645   :  { %681 = dma.done.wait [#allocation12], 64  }
 0x646   :  { %682 = vsyncadd [#allocation12], 4294967232 }
 0x647   :  { %439 = vsyncpa [#allocation3], 1 }
 0x648   :  { %440 = vsyncpa [#allocation6], 1 }
 0x649   :  { %441 = vsyncpa [#allocation9], 1 }
 0x64a   :  { %442 = vsyncpa [#allocation4], 1 }
 0x64b   :  { %443 = vsyncpa [#allocation12], 1 }

</bundles_post_ra>
